<compile_context>
chip_gen: v6e
topology: v6e:2x2x1
jax: 0.10.0
libtpu: 0.0.40
codegen_flags: <defaults>
</compile_context>

<pallas_src>
import functools

import numpy as np
import jax
import jax.numpy as jnp
from jax.experimental import pallas as pl
from jax.experimental.pallas import tpu as pltpu


def _round_up(n, m):
    return ((n + m - 1) // m) * m


# ----------------------------------------------------------------------------------
# Kernel
# ----------------------------------------------------------------------------------
def cvae_kernel(*refs, layout, n_groups):
    """One batch tile of the full CVAE forward.

    refs = (x_ref, y_ref, eps_ref, *packed_param_refs, dec_ref, mu_ref, logvar_ref)
    layout[name] = (group_index, row_offset, n_rows)  -- all static Python ints.
    """
    x_ref, y_ref, eps_ref = refs[:3]
    p_refs = refs[3:3 + n_groups]
    dec_ref, mu_ref, logvar_ref = refs[3 + n_groups:]

    def param(name):
        g, o, r = layout[name]
        return p_refs[g][o:o + r, :]          # static, 8-aligned sublane view

    x = x_ref[...]        # (tm, D)
    y = y_ref[...]        # (tm, 1)
    eps = eps_ref[...]    # (tm, L)

    # Hoist all parameter reads (read each ref view exactly once).
    we1x, we1y, be1 = param("we1x"), param("we1y"), param("be1")
    we2, be2 = param("we2"), param("be2")
    w3mu, w3lv = param("we3mu"), param("we3lv")
    b3mu, b3lv = param("be3mu"), param("be3lv")
    wd1z, wd1y, bd1 = param("wd1z"), param("wd1y"), param("bd1")
    wd2, bd2 = param("wd2"), param("bd2")
    wd3, bd3 = param("wd3"), param("bd3")

    # ---------------- encoder ----------------
    # Linear(D+1 -> H1) on cat([x, y]) == x @ We1x + y * We1y_row + b   (VPU FMA, no K=1 matmul)
    h1 = jnp.dot(x, we1x, preferred_element_type=jnp.float32)
    h1 = jnp.maximum(h1 + (y * we1y + be1), 0.0)

    h2 = jnp.maximum(jnp.dot(h1, we2, preferred_element_type=jnp.float32) + be2, 0.0)

    # Final encoder layer split into mu / logvar halves -> no unaligned lane slice.
    mu = jnp.dot(h2, w3mu, preferred_element_type=jnp.float32) + b3mu
    logvar = jnp.dot(h2, w3lv, preferred_element_type=jnp.float32) + b3lv

    # ---------------- reparameterize ----------------
    z = mu + eps * jnp.exp(0.5 * logvar)

    # ---------------- decoder ----------------
    # Linear(L+1 -> H2) on cat([z, y]) == z @ Wd1z + y * Wd1y_row + b
    d1 = jnp.dot(z, wd1z, preferred_element_type=jnp.float32)
    d1 = jnp.maximum(d1 + (y * wd1y + bd1), 0.0)

    d2 = jnp.maximum(jnp.dot(d1, wd2, preferred_element_type=jnp.float32) + bd2, 0.0)

    logits = jnp.dot(d2, wd3, preferred_element_type=jnp.float32) + bd3
    dec = jax.nn.sigmoid(logits)    # final_activation == 'sigmoid'

    dec_ref[...] = dec.astype(dec_ref.dtype)
    mu_ref[...] = mu.astype(mu_ref.dtype)
    logvar_ref[...] = logvar.astype(logvar_ref.dtype)


# ----------------------------------------------------------------------------------
# Wrapper
# ----------------------------------------------------------------------------------
def cvae_forward(x, y, eps, packed_params, layout, *, latent_dim, block_b=256):
    """Runs the CVAE forward pass in a single Pallas kernel (grid over batch tiles).

    x:   (B, input_dim)  float32
    y:   (B, 1) or (B,)  float32  (condition)
    eps: (B, latent_dim) float32  (reparameterization noise)
    """
    B, D = x.shape
    L = latent_dim
    if y.ndim == 1:
        y = y[:, None]
    n_groups = len(packed_params)

    # Batch tile: up to `block_b` rows (fills the MXU M dimension for large batches),
    # always a multiple of 8.  Pad the batch so the grid divides evenly.
    tm = min(block_b, _round_up(B, 8))
    Bp = _round_up(B, tm)
    if Bp != B:
        padb = Bp - B
        x = jnp.pad(x, ((0, padb), (0, 0)))
        y = jnp.pad(y, ((0, padb), (0, 0)))
        eps = jnp.pad(eps, ((0, padb), (0, 0)))

    grid = (Bp // tm,)

    def batch_spec(cols):
        return pl.BlockSpec((tm, cols), lambda i: (i, 0))

    def resident_spec(shape):
        # Same block index every grid step -> weights stay resident in VMEM.
        return pl.BlockSpec(shape, lambda i: (0, 0))

    in_specs = [batch_spec(D), batch_spec(1), batch_spec(L)] + [
        resident_spec(p.shape) for p in packed_params
    ]
    out_specs = (batch_spec(D), batch_spec(L), batch_spec(L))
    out_shape = (
        jax.ShapeDtypeStruct((Bp, D), jnp.float32),   # decoded
        jax.ShapeDtypeStruct((Bp, L), jnp.float32),   # mu
        jax.ShapeDtypeStruct((Bp, L), jnp.float32),   # logvar
    )

    kernel = functools.partial(cvae_kernel, layout=layout, n_groups=n_groups)

    dec, mu, logvar = pl.pallas_call(
        kernel,
        out_shape=out_shape,
        grid_spec=pltpu.PrefetchScalarGridSpec(
            num_scalar_prefetch=0,
            grid=grid,
            in_specs=in_specs,
            out_specs=out_specs,
        ),
        compiler_params=pltpu.CompilerParams(
            dimension_semantics=("parallel",),   # batch tiles shard across TCs on v7x
        ),
    )(x, y, eps, *packed_params)

    if Bp != B:
        dec, mu, logvar = dec[:B], mu[:B], logvar[:B]
    return dec, mu, logvar


# ----------------------------------------------------------------------------------
# Parameter construction / packing
# ----------------------------------------------------------------------------------
def init_params(key, input_dim, latent_dim, hidden_dim_1, hidden_dim_2):
    """Deterministic synthetic parameters, stored as (in_features, out_features).

    First layers of encoder/decoder are split into the x/z part and the y (condition)
    part, equivalent to concatenating [x, y] / [z, y] before a single Linear.
    """
    def lin(key, din, dout, scale=0.05):
        kw, kb = jax.random.split(key)
        w = scale * jax.random.normal(kw, (din, dout), dtype=jnp.float32)
        b = scale * jax.random.normal(kb, (1, dout), dtype=jnp.float32)
        return w, b

    keys = jax.random.split(key, 6)
    we1_full, be1 = lin(keys[0], input_dim + 1, hidden_dim_1)
    we2, be2 = lin(keys[1], hidden_dim_1, hidden_dim_2)
    we3, be3 = lin(keys[2], hidden_dim_2, 2 * latent_dim)
    wd1_full, bd1 = lin(keys[3], latent_dim + 1, hidden_dim_2)
    wd2, bd2 = lin(keys[4], hidden_dim_2, hidden_dim_1)
    wd3, bd3 = lin(keys[5], hidden_dim_1, input_dim)

    return {
        "we1x": we1_full[:input_dim, :],
        "we1y": we1_full[input_dim:, :],
        "be1": be1,
        "we2": we2, "be2": be2,
        "we3": we3, "be3": be3,
        "wd1z": wd1_full[:latent_dim, :],
        "wd1y": wd1_full[latent_dim:, :],
        "bd1": bd1,
        "wd2": wd2, "bd2": bd2,
        "wd3": wd3, "bd3": bd3,
    }


def pack_cvae_params(params, latent_dim):
    """Packs all parameters into one 2-D f32 array per distinct lane width.

    Each sub-tensor starts at an 8-aligned row.  Returns (packed_arrays, layout) where
    layout[name] = (group_index, row_offset, n_rows).
    The final encoder layer (we3 / be3) is split into mu / logvar halves here.
    """
    L = latent_dim
    we3, be3 = params["we3"], params["be3"]
    tensors = {
        "we1x": params["we1x"], "we1y": params["we1y"], "be1": params["be1"],
        "we2": params["we2"], "be2": params["be2"],
        "we3mu": we3[:, :L], "we3lv": we3[:, L:],
        "be3mu": be3[:, :L], "be3lv": be3[:, L:],
        "wd1z": params["wd1z"], "wd1y": params["wd1y"], "bd1": params["bd1"],
        "wd2": params["wd2"], "bd2": params["bd2"],
        "wd3": params["wd3"], "bd3": params["bd3"],
    }

    groups = {}  # lane_width -> [names]
    for name, a in tensors.items():
        groups.setdefault(int(a.shape[1]), []).append(name)

    packed, layout = [], {}
    for gi, lane in enumerate(sorted(groups.keys(), reverse=True)):
        names = groups[lane]
        offsets, off = {}, 0
        for name in names:
            r = int(tensors[name].shape[0])
            offsets[name] = (off, r)
            off += _round_up(r, 8)
        buf = np.zeros((_round_up(off, 8), lane), np.float32)
        for name in names:
            o, r = offsets[name]
            buf[o:o + r, :] = np.asarray(tensors[name], np.float32)
            layout[name] = (gi, o, r)
        packed.append(jnp.asarray(buf))
    return packed, layout


# ----------------------------------------------------------------------------------
# Pure-JAX reference (matches the PyTorch forward)
# ----------------------------------------------------------------------------------
def reference_forward(x, y, eps, params, latent_dim):
    relu = lambda t: jnp.maximum(t, 0.0)
    h1 = relu(x @ params["we1x"] + y @ params["we1y"] + params["be1"])
    h2 = relu(h1 @ params["we2"] + params["be2"])
    enc = h2 @ params["we3"] + params["be3"]
    mu, logvar = enc[:, :latent_dim], enc[:, latent_dim:]
    z = mu + eps * jnp.exp(0.5 * logvar)
    d1 = relu(z @ params["wd1z"] + y @ params["wd1y"] + params["bd1"])
    d2 = relu(d1 @ params["wd2"] + params["bd2"])
    dec = jax.nn.sigmoid(d2 @ params["wd3"] + params["bd3"])
    return dec, mu, logvar


if __name__ == "__main__":
    # Small shapes consistent with the module's forward.
    n_atoms_surf = 16
    n_elements = 4
    input_dim = n_atoms_surf * n_elements     # 64
    latent_dim = 8
    hidden_dim_1 = 128
    hidden_dim_2 = 64
    batch = 8

    key = jax.random.PRNGKey(0)
    kx, ky, keps, kp = jax.random.split(key, 4)

    x = jax.random.uniform(kx, (batch, input_dim), dtype=jnp.float32)
    y = jax.random.uniform(ky, (batch, 1), dtype=jnp.float32)          # condition (cond_dim=1)
    eps = jax.random.normal(keps, (batch, latent_dim), dtype=jnp.float32)

    params = init_params(kp, input_dim, latent_dim, hidden_dim_1, hidden_dim_2)
    packed, layout = pack_cvae_params(params, latent_dim)

    dec, mu, logvar = cvae_forward(x, y, eps, packed, layout, latent_dim=latent_dim)
    jax.block_until_ready((dec, mu, logvar))

    # Verify against pure-JAX reference.
    dec_ref, mu_ref, logvar_ref = reference_forward(x, y, eps, params, latent_dim)
    assert dec.shape == (batch, input_dim)
    assert mu.shape == (batch, latent_dim)
    assert logvar.shape == (batch, latent_dim)
    assert jnp.allclose(dec, dec_ref, atol=1e-5)
    assert jnp.allclose(mu, mu_ref, atol=1e-5)
    assert jnp.allclose(logvar, logvar_ref, atol=1e-5)

    print("KERNEL_OK")
</pallas_src>

<mosaic_0001>
module attributes {stable_mosaic.version = 11 : i64} {
  func.func @cvae_kernel(%arg0: i32, %arg1: memref<8x64xf32, #tpu.memory_space<vmem>>, %arg2: memref<8x1xf32, #tpu.memory_space<vmem>>, %arg3: memref<8x8xf32, #tpu.memory_space<vmem>>, %arg4: memref<152x128xf32, #tpu.memory_space<vmem>>, %arg5: memref<296x64xf32, #tpu.memory_space<vmem>>, %arg6: memref<144x8xf32, #tpu.memory_space<vmem>>, %arg7: memref<8x64xf32, #tpu.memory_space<vmem>>, %arg8: memref<8x8xf32, #tpu.memory_space<vmem>>, %arg9: memref<8x8xf32, #tpu.memory_space<vmem>>) attributes {dimension_semantics = [#tpu.dimension_semantics<parallel>], iteration_bounds = array<i64: 1>, scalar_prefetch = 0 : i64, scratch_operands = 0 : i64, tpu.core_type = #tpu.core_type<tc>, window_params = [{transform_indices = @transform_0, window_bounds = array<i64: 8, 64>}, {transform_indices = @transform_1, window_bounds = array<i64: 8, 1>}, {transform_indices = @transform_2, window_bounds = array<i64: 8, 8>}, {pipeline_mode = #tpu.pipeline_mode<synchronous>, transform_indices = @transform_3, window_bounds = array<i64: 152, 128>}, {pipeline_mode = #tpu.pipeline_mode<synchronous>, transform_indices = @transform_4, window_bounds = array<i64: 296, 64>}, {pipeline_mode = #tpu.pipeline_mode<synchronous>, transform_indices = @transform_5, window_bounds = array<i64: 144, 8>}, {transform_indices = @transform_6, window_bounds = array<i64: 8, 64>}, {transform_indices = @transform_7, window_bounds = array<i64: 8, 8>}, {transform_indices = @transform_8, window_bounds = array<i64: 8, 8>}]} {
    %c0 = arith.constant 0 : index
    %c0_0 = arith.constant 0 : index
    %0 = vector.load %arg1[%c0, %c0_0] : memref<8x64xf32, #tpu.memory_space<vmem>>, vector<8x64xf32>
    %c0_1 = arith.constant 0 : index
    %c0_2 = arith.constant 0 : index
    %1 = vector.load %arg2[%c0_1, %c0_2] : memref<8x1xf32, #tpu.memory_space<vmem>>, vector<8x1xf32>
    %c0_3 = arith.constant 0 : index
    %c0_4 = arith.constant 0 : index
    %2 = vector.load %arg3[%c0_3, %c0_4] : memref<8x8xf32, #tpu.memory_space<vmem>>, vector<8x8xf32>
    %c0_5 = arith.constant 0 : index
    %c0_6 = arith.constant 0 : index
    %3 = vector.load %arg4[%c0_5, %c0_6] : memref<152x128xf32, #tpu.memory_space<vmem>>, vector<64x128xf32>
    %c64 = arith.constant 64 : index
    %c0_7 = arith.constant 0 : index
    %4 = vector.load %arg4[%c64, %c0_7] : memref<152x128xf32, #tpu.memory_space<vmem>>, vector<1x128xf32>
    %c72 = arith.constant 72 : index
    %c0_8 = arith.constant 0 : index
    %5 = vector.load %arg4[%c72, %c0_8] : memref<152x128xf32, #tpu.memory_space<vmem>>, vector<1x128xf32>
    %c0_9 = arith.constant 0 : index
    %c0_10 = arith.constant 0 : index
    %6 = vector.load %arg5[%c0_9, %c0_10] : memref<296x64xf32, #tpu.memory_space<vmem>>, vector<128x64xf32>
    %c128 = arith.constant 128 : index
    %c0_11 = arith.constant 0 : index
    %7 = vector.load %arg5[%c128, %c0_11] : memref<296x64xf32, #tpu.memory_space<vmem>>, vector<1x64xf32>
    %c0_12 = arith.constant 0 : index
    %c0_13 = arith.constant 0 : index
    %8 = vector.load %arg6[%c0_12, %c0_13] : memref<144x8xf32, #tpu.memory_space<vmem>>, vector<64x8xf32>
    %c64_14 = arith.constant 64 : index
    %c0_15 = arith.constant 0 : index
    %9 = vector.load %arg6[%c64_14, %c0_15] : memref<144x8xf32, #tpu.memory_space<vmem>>, vector<64x8xf32>
    %c128_16 = arith.constant 128 : index
    %c0_17 = arith.constant 0 : index
    %10 = vector.load %arg6[%c128_16, %c0_17] : memref<144x8xf32, #tpu.memory_space<vmem>>, vector<1x8xf32>
    %c136 = arith.constant 136 : index
    %c0_18 = arith.constant 0 : index
    %11 = vector.load %arg6[%c136, %c0_18] : memref<144x8xf32, #tpu.memory_space<vmem>>, vector<1x8xf32>
    %c136_19 = arith.constant 136 : index
    %c0_20 = arith.constant 0 : index
    %12 = vector.load %arg5[%c136_19, %c0_20] : memref<296x64xf32, #tpu.memory_space<vmem>>, vector<8x64xf32>
    %c144 = arith.constant 144 : index
    %c0_21 = arith.constant 0 : index
    %13 = vector.load %arg5[%c144, %c0_21] : memref<296x64xf32, #tpu.memory_space<vmem>>, vector<1x64xf32>
    %c152 = arith.constant 152 : index
    %c0_22 = arith.constant 0 : index
    %14 = vector.load %arg5[%c152, %c0_22] : memref<296x64xf32, #tpu.memory_space<vmem>>, vector<1x64xf32>
    %c80 = arith.constant 80 : index
    %c0_23 = arith.constant 0 : index
    %15 = vector.load %arg4[%c80, %c0_23] : memref<152x128xf32, #tpu.memory_space<vmem>>, vector<64x128xf32>
    %c144_24 = arith.constant 144 : index
    %c0_25 = arith.constant 0 : index
    %16 = vector.load %arg4[%c144_24, %c0_25] : memref<152x128xf32, #tpu.memory_space<vmem>>, vector<1x128xf32>
    %c160 = arith.constant 160 : index
    %c0_26 = arith.constant 0 : index
    %17 = vector.load %arg5[%c160, %c0_26] : memref<296x64xf32, #tpu.memory_space<vmem>>, vector<128x64xf32>
    %c288 = arith.constant 288 : index
    %c0_27 = arith.constant 0 : index
    %18 = vector.load %arg5[%c288, %c0_27] : memref<296x64xf32, #tpu.memory_space<vmem>>, vector<1x64xf32>
    %cst = arith.constant dense<0.000000e+00> : vector<8x128xf32>
    %19 = tpu.matmul %0, %3, %cst {dimension_numbers = #tpu.dot_dimension_numbers<[1], [0], [0], [1], [0, 0, 1, 1], [], []>} : vector<8x64xf32>, vector<64x128xf32>, vector<8x128xf32> -> vector<8x128xf32>
    %20 = vector.broadcast %1 : vector<8x1xf32> to vector<8x128xf32>
    %21 = vector.broadcast %4 : vector<1x128xf32> to vector<8x128xf32>
    %22 = arith.mulf %20, %21 : vector<8x128xf32>
    %23 = vector.broadcast %5 : vector<1x128xf32> to vector<8x128xf32>
    %24 = arith.addf %22, %23 : vector<8x128xf32>
    %25 = arith.addf %19, %24 : vector<8x128xf32>
    %cst_28 = arith.constant 0.000000e+00 : f32
    %26 = vector.broadcast %cst_28 : f32 to vector<8x128xf32>
    %27 = arith.maximumf %25, %26 : vector<8x128xf32>
    %cst_29 = arith.constant dense<0.000000e+00> : vector<8x64xf32>
    %28 = tpu.matmul %27, %6, %cst_29 {dimension_numbers = #tpu.dot_dimension_numbers<[1], [0], [0], [1], [0, 0, 1, 1], [], []>} : vector<8x128xf32>, vector<128x64xf32>, vector<8x64xf32> -> vector<8x64xf32>
    %29 = vector.broadcast %7 : vector<1x64xf32> to vector<8x64xf32>
    %30 = arith.addf %28, %29 : vector<8x64xf32>
    %cst_30 = arith.constant 0.000000e+00 : f32
    %31 = vector.broadcast %cst_30 : f32 to vector<8x64xf32>
    %32 = arith.maximumf %30, %31 : vector<8x64xf32>
    %cst_31 = arith.constant dense<0.000000e+00> : vector<8x8xf32>
    %33 = tpu.matmul %32, %8, %cst_31 {dimension_numbers = #tpu.dot_dimension_numbers<[1], [0], [0], [1], [0, 0, 1, 1], [], []>} : vector<8x64xf32>, vector<64x8xf32>, vector<8x8xf32> -> vector<8x8xf32>
    %34 = vector.broadcast %10 : vector<1x8xf32> to vector<8x8xf32>
    %35 = arith.addf %33, %34 : vector<8x8xf32>
    %cst_32 = arith.constant dense<0.000000e+00> : vector<8x8xf32>
    %36 = tpu.matmul %32, %9, %cst_32 {dimension_numbers = #tpu.dot_dimension_numbers<[1], [0], [0], [1], [0, 0, 1, 1], [], []>} : vector<8x64xf32>, vector<64x8xf32>, vector<8x8xf32> -> vector<8x8xf32>
    %37 = vector.broadcast %11 : vector<1x8xf32> to vector<8x8xf32>
    %38 = arith.addf %36, %37 : vector<8x8xf32>
    %cst_33 = arith.constant 5.000000e-01 : f32
    %39 = vector.broadcast %cst_33 : f32 to vector<8x8xf32>
    %40 = arith.mulf %39, %38 : vector<8x8xf32>
    %41 = math.exp %40 : vector<8x8xf32>
    %42 = arith.mulf %2, %41 : vector<8x8xf32>
    %43 = arith.addf %35, %42 : vector<8x8xf32>
    %cst_34 = arith.constant dense<0.000000e+00> : vector<8x64xf32>
    %44 = tpu.matmul %43, %12, %cst_34 {dimension_numbers = #tpu.dot_dimension_numbers<[1], [0], [0], [1], [0, 0, 1, 1], [], []>} : vector<8x8xf32>, vector<8x64xf32>, vector<8x64xf32> -> vector<8x64xf32>
    %45 = vector.broadcast %1 : vector<8x1xf32> to vector<8x64xf32>
    %46 = vector.broadcast %13 : vector<1x64xf32> to vector<8x64xf32>
    %47 = arith.mulf %45, %46 : vector<8x64xf32>
    %48 = vector.broadcast %14 : vector<1x64xf32> to vector<8x64xf32>
    %49 = arith.addf %47, %48 : vector<8x64xf32>
    %50 = arith.addf %44, %49 : vector<8x64xf32>
    %cst_35 = arith.constant 0.000000e+00 : f32
    %51 = vector.broadcast %cst_35 : f32 to vector<8x64xf32>
    %52 = arith.maximumf %50, %51 : vector<8x64xf32>
    %cst_36 = arith.constant dense<0.000000e+00> : vector<8x128xf32>
    %53 = tpu.matmul %52, %15, %cst_36 {dimension_numbers = #tpu.dot_dimension_numbers<[1], [0], [0], [1], [0, 0, 1, 1], [], []>} : vector<8x64xf32>, vector<64x128xf32>, vector<8x128xf32> -> vector<8x128xf32>
    %54 = vector.broadcast %16 : vector<1x128xf32> to vector<8x128xf32>
    %55 = arith.addf %53, %54 : vector<8x128xf32>
    %cst_37 = arith.constant 0.000000e+00 : f32
    %56 = vector.broadcast %cst_37 : f32 to vector<8x128xf32>
    %57 = arith.maximumf %55, %56 : vector<8x128xf32>
    %cst_38 = arith.constant dense<0.000000e+00> : vector<8x64xf32>
    %58 = tpu.matmul %57, %17, %cst_38 {dimension_numbers = #tpu.dot_dimension_numbers<[1], [0], [0], [1], [0, 0, 1, 1], [], []>} : vector<8x128xf32>, vector<128x64xf32>, vector<8x64xf32> -> vector<8x64xf32>
    %59 = vector.broadcast %18 : vector<1x64xf32> to vector<8x64xf32>
    %60 = arith.addf %58, %59 : vector<8x64xf32>
    %61 = arith.negf %60 : vector<8x64xf32>
    %62 = math.exp %61 : vector<8x64xf32>
    %cst_39 = arith.constant 1.000000e+00 : f32
    %63 = vector.broadcast %cst_39 : f32 to vector<8x64xf32>
    %64 = arith.addf %63, %62 : vector<8x64xf32>
    %65 = arith.divf %63, %64 : vector<8x64xf32>
    %c0_40 = arith.constant 0 : index
    %c0_41 = arith.constant 0 : index
    %66 = vector.load %arg7[%c0_40, %c0_41] : memref<8x64xf32, #tpu.memory_space<vmem>>, vector<8x64xf32>
    tpu.vector_store %arg7[%c0_40, %c0_41], %65 {strides = array<i32>} : memref<8x64xf32, #tpu.memory_space<vmem>>, vector<8x64xf32>,
    %c0_42 = arith.constant 0 : index
    %c0_43 = arith.constant 0 : index
    %67 = vector.load %arg8[%c0_42, %c0_43] : memref<8x8xf32, #tpu.memory_space<vmem>>, vector<8x8xf32>
    tpu.vector_store %arg8[%c0_42, %c0_43], %35 {strides = array<i32>} : memref<8x8xf32, #tpu.memory_space<vmem>>, vector<8x8xf32>,
    %c0_44 = arith.constant 0 : index
    %c0_45 = arith.constant 0 : index
    %68 = vector.load %arg9[%c0_44, %c0_45] : memref<8x8xf32, #tpu.memory_space<vmem>>, vector<8x8xf32>
    tpu.vector_store %arg9[%c0_44, %c0_45], %38 {strides = array<i32>} : memref<8x8xf32, #tpu.memory_space<vmem>>, vector<8x8xf32>,
    return
  }
  func.func @transform_0(%arg0: i32) -> (i32, i32) {
    %c0_i32 = arith.constant 0 : i32
    %c0_i32_0 = arith.constant 0 : i32
    return %arg0, %c0_i32 : i32, i32
  }
  func.func @transform_1(%arg0: i32) -> (i32, i32) {
    %c0_i32 = arith.constant 0 : i32
    %c0_i32_0 = arith.constant 0 : i32
    return %arg0, %c0_i32 : i32, i32
  }
  func.func @transform_2(%arg0: i32) -> (i32, i32) {
    %c0_i32 = arith.constant 0 : i32
    %c0_i32_0 = arith.constant 0 : i32
    return %arg0, %c0_i32 : i32, i32
  }
  func.func @transform_3(%arg0: i32) -> (i32, i32) {
    %c0_i32 = arith.constant 0 : i32
    %c0_i32_0 = arith.constant 0 : i32
    %c0_i32_1 = arith.constant 0 : i32
    return %c0_i32, %c0_i32_0 : i32, i32
  }
  func.func @transform_4(%arg0: i32) -> (i32, i32) {
    %c0_i32 = arith.constant 0 : i32
    %c0_i32_0 = arith.constant 0 : i32
    %c0_i32_1 = arith.constant 0 : i32
    return %c0_i32, %c0_i32_0 : i32, i32
  }
  func.func @transform_5(%arg0: i32) -> (i32, i32) {
    %c0_i32 = arith.constant 0 : i32
    %c0_i32_0 = arith.constant 0 : i32
    %c0_i32_1 = arith.constant 0 : i32
    return %c0_i32, %c0_i32_0 : i32, i32
  }
  func.func @transform_6(%arg0: i32) -> (i32, i32) {
    %c0_i32 = arith.constant 0 : i32
    %c0_i32_0 = arith.constant 0 : i32
    return %arg0, %c0_i32 : i32, i32
  }
  func.func @transform_7(%arg0: i32) -> (i32, i32) {
    %c0_i32 = arith.constant 0 : i32
    %c0_i32_0 = arith.constant 0 : i32
    return %arg0, %c0_i32 : i32, i32
  }
  func.func @transform_8(%arg0: i32) -> (i32, i32) {
    %c0_i32 = arith.constant 0 : i32
    %c0_i32_0 = arith.constant 0 : i32
    return %arg0, %c0_i32 : i32, i32
  }
}

</mosaic_0001>

<bundles_post_ra>
// kernel: tpu_custom_call.1
= control target key start
LH: loop header
LB: loop body
LE: loop exit
PB: predicated region body
PF: predicated region fallthrough
CT: control target
= control target key end

     0   :  { %14 = vsyncpa [#allocation3], 0  ;;  %v1028_v1 = vmov 0.0   ;;  %vm1029_vm0 = vmmov 0   ;;  %v1030_v3 = vmov 0   ;;  %s1410_s0 = inlined_call_operand.vmem [shape: f32[8,64], index: 0, kind: input, shape index: {}]   ;;  %s1411_s1 = inlined_call_operand.vmem [shape: f32[8,1], index: 1, kind: input, shape index: {}]   ;;  %s1412_s2 = inlined_call_operand.vmem [shape: f32[8,8], index: 2, kind: input, shape index: {}]   ;;  %s1413_s3 = inlined_call_operand.vmem [shape: f32[152,128], index: 3, kind: input, shape index: {}]   ;;  %s1414_s4 = inlined_call_operand.vmem [shape: f32[296,64], index: 4, kind: input, shape index: {}]   ;;  %s1415_s5 = inlined_call_operand.vmem [shape: f32[144,8], index: 5, kind: input, shape index: {}]   ;;  %s1416_s6 = inlined_call_operand.hbm [shape: f32[8,64], index: 6, kind: output, shape index: {0}]   ;;  %s1417_s7 = inlined_call_operand.hbm [shape: f32[8,8], index: 7, kind: output, shape index: {1}]   ;;  %s1418_s8 = inlined_call_operand.hbm [shape: f32[8,8], index: 8, kind: output, shape index: {2}]  }
   0x1   :  { %v38_v0 = vld [vmem:[%s1413_s3 + $0x38] sm:$0xff]  ;;  %800 = vmatprep.subr.mxu1 %v1028_v1  ;;  %v37_v2 = vld [vmem:[%s1413_s3 + $0x30] sm:$0xff]  ;;  %816 = vmatprep.mubr.msk.f32.mxu1 %vm1029_vm0, %v1028_v1  ;;  %v36_v4 = vld [vmem:[%s1413_s3 + $0x28] sm:$0xff] }
   0x2   :  { %801 = vmatpush3.msra.mxu1 %v38_v0  ;;  %957 = vset.pattern.permute.xlu0 %v1030_v3  ;;  %v29_v5 = vld [vmem:[%s1411_s1] sm:$0xff]  ;;  %v34_v7 = vld [vmem:[%s1413_s3 + $0x18] sm:$0xff] }
   0x3   :  { %802 = vmatprep.subr.mxu1 %v1028_v1  ;;  %854 = vmatprep.subr.mxu0 %v1028_v1  ;;  %v35_v6 = vld [vmem:[%s1413_s3 + $0x20] sm:$0xff] }
   0x4   :  { %803 = vmatpush3.msra.mxu1 %v37_v2  ;;  %107 = vperm.xlu0 %957, %v29_v5  }
   0x5   :  { %804 = vmatprep.subr.mxu1 %v1028_v1  ;;  %870 = vmatprep.mubr.msk.f32.mxu0 %vm1029_vm0, %v1028_v1 }
   0x6   :  { %805 = vmatpush3.msra.mxu1 %v36_v4 }
   0x7   :  { %806 = vmatprep.subr.mxu1 %v1028_v1 }
   0x8   :  { %807 = vmatpush3.msra.mxu1 %v35_v6 }
   0x9   :  { %15 = vsyncpa [#allocation5], 0  ;;  %808 = vmatprep.subr.mxu1 %v1028_v1  ;;  %v33_v8 = vld [vmem:[%s1413_s3 + $0x10] sm:$0xff]  ;;  %v32_v9 = vld [vmem:[%s1413_s3 + $0x8] sm:$0xff]  ;;  %vm120_vm1 = vcmask 523264   ;;  %vm436_vm2 = vcmask 64512  }
   0xa   :  { %809 = vmatpush3.msra.mxu1 %v34_v7  ;;  %v31_v10 = vld [vmem:[%s1413_s3] sm:$0xff]  ;;  %v56_v12 = vld [vmem:[%s1414_s4 + $0x78] sm:$0xff]  ;;  %v55_v13 = vld [vmem:[%s1414_s4 + $0x70] sm:$0xff] }
   0xb   :  { %810 = vmatprep.subr.mxu1 %v1028_v1  ;;  %v28_v11 = vld [vmem:[%s1410_s0] sm:$0xff]  ;;  %v54_v14 = vld [vmem:[%s1414_s4 + $0x68] sm:$0xff]  ;;  %v52_v16 = vld [vmem:[%s1414_s4 + $0x58] sm:$0xff] }
   0xc   :  { %811 = vmatpush3.msra.mxu1 %v33_v8  ;;  %v53_v15 = vld [vmem:[%s1414_s4 + $0x60] sm:$0xff]  ;;  %v51_v17 = vld [vmem:[%s1414_s4 + $0x50] sm:$0xff]  ;;  %v50_v18 = vld [vmem:[%s1414_s4 + $0x48] sm:$0xff] }
   0xd   :  { %812 = vmatprep.subr.mxu1 %v1028_v1  ;;  %v49_v19 = vld [vmem:[%s1414_s4 + $0x40] sm:$0xff]  ;;  %v48_v20 = vld [vmem:[%s1414_s4 + $0x38] sm:$0xff]  ;;  %v47_v21 = vld [vmem:[%s1414_s4 + $0x30] sm:$0xff] }
   0xe   :  { %813 = vmatpush3.msra.mxu1 %v32_v9  ;;  %v46_v22 = vld [vmem:[%s1414_s4 + $0x28] sm:$0xff]  ;;  %v45_v23 = vld [vmem:[%s1414_s4 + $0x20] sm:$0xff]  ;;  %v44_v24 = vld [vmem:[%s1414_s4 + $0x18] sm:$0xff] }
   0xf   :  { %814 = vmatprep.subr.mxu1 %v1028_v1  ;;  %v43_v25 = vld [vmem:[%s1414_s4 + $0x10] sm:$0xff]  ;;  %v42_v26 = vld [vmem:[%s1414_s4 + $0x8] sm:$0xff]  ;;  %v41_v27 = vld [vmem:[%s1414_s4] sm:$0xff] }
  0x10   :  { %815 = vmatpush3.msra.mxu1 %v31_v10  ;;  %v65_v28 = vld [vmem:[%s1415_s5 + $0x38] sm:$0xff]  ;;  %v64_v29 = vld [vmem:[%s1415_s5 + $0x30] sm:$0xff]  ;;  %v63_v30 = vld [vmem:[%s1415_s5 + $0x28] sm:$0xff] }
  0x11   :  { %817 = vmatmul.mubr.msk.f32.vlgmr.msra.gmra.mxu1 %vm120_vm1, %v28_v11  ;;  %819 = vmatprep.subr.mxu1 %v1028_v1  ;;  %v62_v31 = vld [vmem:[%s1415_s5 + $0x20] sm:$0xff]  ;;  %v61_v32 = vld [vmem:[%s1415_s5 + $0x18] sm:$0xff]  ;;  %v60_v33 = vld [vmem:[%s1415_s5 + $0x10] sm:$0xff] }
  0x12   :  { %820 = vmatpush3.msra.mxu1 %v56_v12  ;;  %851 = vmatprep.mubr.msk.f32.mxu1 %vm1029_vm0, %v1028_v1  ;;  %v713_v34 = vld [vmem:[%s1413_s3 + $0x40] ss:$0 sm:$0xff]  ;;  %v714_v37 = vld [vmem:[%s1413_s3 + $0x48] ss:$0 sm:$0xff]  ;;  %v73_v50 = vld [vmem:[%s1415_s5 + $0x78] sm:$0xff] }
  0x13   :  { %821 = vmatprep.subr.mxu1 %v1028_v1  ;;  %855 = vmatpush3.msra.mxu0 %v65_v28  ;;  %v59_v43 = vld [vmem:[%s1415_s5 + $0x8] sm:$0xff]  ;;  %v58_v44 = vld [vmem:[%s1415_s5] sm:$0xff]  ;;  %v72_v51 = vld [vmem:[%s1415_s5 + $0x70] sm:$0xff] }
  0x14   :  { %822 = vmatpush3.msra.mxu1 %v55_v13  ;;  %856 = vmatprep.subr.mxu0 %v1028_v1  ;;  %v716_v45 = vld [vmem:[%s1414_s4 + $0x80] ss:$0 sm:$0xff]  ;;  %v71_v52 = vld [vmem:[%s1415_s5 + $0x68] sm:$0xff]  ;;  %v69_v54 = vld [vmem:[%s1415_s5 + $0x58] sm:$0xff] }
  0x15   :  { %823 = vmatprep.subr.mxu1 %v1028_v1  ;;  %857 = vmatpush3.msra.mxu0 %v64_v29  ;;  %v70_v53 = vld [vmem:[%s1415_s5 + $0x60] sm:$0xff]  ;;  %v68_v55 = vld [vmem:[%s1415_s5 + $0x50] sm:$0xff]  ;;  %v67_v56 = vld [vmem:[%s1415_s5 + $0x48] sm:$0xff] }
  0x16   :  { %824 = vmatpush3.msra.mxu1 %v54_v14  ;;  %858 = vmatprep.subr.mxu0 %v1028_v1  ;;  %v66_v57 = vld [vmem:[%s1415_s5 + $0x40] sm:$0xff]  ;;  %v76_v58 = vld [vmem:[%s1414_s4 + $0x88] sm:$0xff]  ;;  %v84_v12 = vld [vmem:[%s1413_s3 + $0x78] sm:$0xff] }
  0x17   :  { %825 = vmatprep.subr.mxu1 %v1028_v1  ;;  %859 = vmatpush3.msra.mxu0 %v63_v30  ;;  %v717_v59 = vld [vmem:[%s1415_s5 + $0x80] ss:$0 sm:$0xff]  ;;  %v719_v63 = vld [vmem:[%s1415_s5 + $0x88] ss:$0 sm:$0xff]  ;;  %v83_v13 = vld [vmem:[%s1413_s3 + $0x70] sm:$0xff]  ;;  %s1031_s5 = smov [#allocation4]  }
  0x18   :  { %826 = vmatpush3.msra.mxu1 %v53_v15  ;;  %860 = vmatprep.subr.mxu0 %v1028_v1  ;;  %v30_v6 = vld [vmem:[%s1412_s2] sm:$0xff]  ;;  %v86_v10 = vld [vmem:[%s1413_s3 + $0x88] sm:$0xff]  ;;  %v91_v30 = vld [vmem:[%s1414_s4 + $0xb8] sm:$0xff]  ;;  %s688_s9 = sshll.u32 %s1031_s5, 4  ;;  %s689_s9 = int_to_ptr.vmem [resolvable:$true] %s688_s9 }
  0x19   :  { %827 = vmatprep.subr.mxu1 %v1028_v1  ;;  %861 = vmatpush3.msra.mxu0 %v62_v31  ;;  %v85_v11 = vld [vmem:[%s1413_s3 + $0x80] sm:$0xff]  ;;  %v82_v14 = vld [vmem:[%s1413_s3 + $0x68] sm:$0xff]  ;;  %v721_v31 = vld [vmem:[%s1414_s4 + $0x90] ss:$0 sm:$0xff]  ;;  %s964_s2 = scalar_lea.vmem %s689_s9, 128  ;;  %p969_p1 = scmp.lt.s32.totalorder %s689_s9, %s689_s9 }
  0x1a   :  { %828 = vmatpush3.msra.mxu1 %v52_v16  ;;  %862 = vmatprep.subr.mxu0 %v1028_v1  ;;  %v81_v15 = vld [vmem:[%s1413_s3 + $0x60] sm:$0xff]  ;;  %v80_v16 = vld [vmem:[%s1413_s3 + $0x58] sm:$0xff]  ;;  %v93_v28 = vld [vmem:[%s1414_s4 + $0xc8] sm:$0xff]  ;;  %p965_p0 = scmp.ne.s32.totalorder %s689_s9, %s964_s2  ;;  %p970_p2 = scmp.lt.s32.totalorder %s964_s2, %s964_s2 }
  0x1b   :  { %829 = vmatprep.subr.mxu1 %v1028_v1  ;;  %863 = vmatpush3.msra.mxu0 %v61_v32  ;;  %v92_v29 = vld [vmem:[%s1414_s4 + $0xc0] sm:$0xff] }
  0x1c   :  { %830 = vmatpush3.msra.mxu1 %v51_v17  ;;  %864 = vmatprep.subr.mxu0 %v1028_v1  ;;  %v79_v17 = vld [vmem:[%s1413_s3 + $0x50] sm:$0xff]  ;;  %p971_p3 = por %p970_p2, %p969_p1 }
  0x1d   :  { %831 = vmatprep.subr.mxu1 %v1028_v1  ;;  %865 = vmatpush3.msra.mxu0 %v60_v33  ;;  %v722_v33 = vld [vmem:[%s1414_s4 + $0x98] ss:$0 sm:$0xff] }
  0x1e   :  { %832 = vmatpush3.msra.mxu1 %v50_v18  ;;  %866 = vmatprep.subr.mxu0 %v1028_v1  ;;  %v103_v18 = vld [vmem:[%s1414_s4 + $0x118] sm:$0xff]  ;;  %p972_p4 = pnand %p971_p3, %p965_p0 }
  0x1f   :  { %833 = vmatprep.subr.mxu1 %v1028_v1  ;;  %867 = vmatpush3.msra.mxu0 %v59_v43 }
  0x20   :  { %834 = vmatpush3.msra.mxu1 %v49_v19  ;;  %868 = vmatprep.subr.mxu0 %v1028_v1  ;;  %v102_v19 = vld [vmem:[%s1414_s4 + $0x110] sm:$0xff] }
  0x21   :  { %835 = vmatprep.subr.mxu1 %v1028_v1  ;;  %869 = vmatpush3.msra.mxu0 %v58_v44 }
  0x22   :  { %836 = vmatpush3.msra.mxu1 %v48_v20  ;;  %873 = vmatprep.subr.mxu0 %v1028_v1  ;;  %v101_v20 = vld [vmem:[%s1414_s4 + $0x108] sm:$0xff] }
  0x23   :  { %837 = vmatprep.subr.mxu1 %v1028_v1 }
  0x24   :  { %838 = vmatpush3.msra.mxu1 %v47_v21  ;;  %v100_v21 = vld [vmem:[%s1414_s4 + $0x100] sm:$0xff] }
  0x25   :  { %839 = vmatprep.subr.mxu1 %v1028_v1 }
  0x26   :  { %840 = vmatpush3.msra.mxu1 %v46_v22  ;;  %v99_v22 = vld [vmem:[%s1414_s4 + $0xf8] sm:$0xff] }
  0x27   :  { %841 = vmatprep.subr.mxu1 %v1028_v1 }
  0x28   :  { %842 = vmatpush3.msra.mxu1 %v45_v23  ;;  %v98_v23 = vld [vmem:[%s1414_s4 + $0xf0] sm:$0xff] }
  0x29   :  { %843 = vmatprep.subr.mxu1 %v1028_v1 }
  0x2a   :  { %844 = vmatpush3.msra.mxu1 %v44_v24  ;;  %v97_v24 = vld [vmem:[%s1414_s4 + $0xe8] sm:$0xff] }
  0x2b   :  { %845 = vmatprep.subr.mxu1 %v1028_v1 }
  0x2c   :  { %846 = vmatpush3.msra.mxu1 %v43_v25  ;;  %v96_v25 = vld [vmem:[%s1414_s4 + $0xe0] sm:$0xff] }
  0x2d   :  { %847 = vmatprep.subr.mxu1 %v1028_v1 }
  0x2e   :  { %848 = vmatpush3.msra.mxu1 %v42_v26  ;;  %v95_v26 = vld [vmem:[%s1414_s4 + $0xd8] sm:$0xff] }
  0x2f   :  { %849 = vmatprep.subr.mxu1 %v1028_v1 }
  0x30   :  { %850 = vmatpush3.msra.mxu1 %v41_v27  ;;  %v94_v27 = vld [vmem:[%s1414_s4 + $0xd0] sm:$0xff] }
  0x31   :  { %892 = vmatprep.subr.mxu1 %v1028_v1 }
  0x7f   :  { %v1217_v35 = vpop.permute.xlu0 %107 }
  0x80   :  { %v114_v36 = vmul.f32 %v713_v34, %v1217_v35  ;;  %v430_v32 = vmul.f32 %v721_v31, %v1217_v35  ;;  %v89_v35 = vld [vmem:[%s1414_s4 + $0xa8] sm:$0xff] }
  0x82   :  { %v119_v38 = vadd.f32 %v714_v37, %v114_v36  ;;  %v435_v34 = vadd.f32 %v722_v33, %v430_v32 }
  0xd1   :  { %v190_v39 = vpop.f32.mrf.mxu1 }
  0xd2   :  { %v191_v40 = vadd.f32 %v190_v39, %v119_v38 }
  0xd3   :  { %v818_v41 = vpop.f32.mrf.mxu1 }
  0xd4   :  { %v194_v42 = vmax.f32 %v191_v40, 0.0  ;;  %v90_v40 = vld [vmem:[%s1414_s4 + $0xb0] sm:$0xff]  ;;  %v88_v41 = vld [vmem:[%s1414_s4 + $0xa0] sm:$0xff] }
  0xd6   :  { %852 = vmatmul.mubr.f32.vlgmr.msra.gmra.mxu1 %v194_v42  ;;  %v724_v42 = vld [vmem:[%s1413_s3 + $0x90] ss:$0 sm:$0xff] }
  0xd7   :  { %894 = vmatprep.mubr.msk.f32.mxu1 %vm1029_vm0, %v1028_v1  ;;  %893 = vmatpush3.msra.mxu1 %v76_v58 }
  0xd8   :  { %897 = vmatprep.subr.mxu1 %v1028_v1 }
 0x196   :  { %v265_v46 = vpop.f32.mrf.mxu1 }
 0x197   :  { %v266_v47 = vadd.f32 %v716_v45, %v265_v46 }
 0x198   :  { %v853_v48 = vpop.f32.mrf.mxu1 }
 0x199   :  { %v269_v49 = vmax.f32 %v266_v47, 0.0 }
 0x19b   :  { %871 = vmatmul.mubr.msk.f32.vlgmr.msra.gmra.mxu0 %vm120_vm1, %v269_v49 }
 0x19c   :  { %874 = vmatpush3.msra.mxu0 %v73_v50  ;;  %889 = vmatprep.mubr.msk.f32.mxu0 %vm1029_vm0, %v1028_v1 }
 0x19d   :  { %875 = vmatprep.subr.mxu0 %v1028_v1 }
 0x19e   :  { %876 = vmatpush3.msra.mxu0 %v72_v51 }
 0x19f   :  { %877 = vmatprep.subr.mxu0 %v1028_v1 }
 0x1a0   :  { %878 = vmatpush3.msra.mxu0 %v71_v52 }
 0x1a1   :  { %879 = vmatprep.subr.mxu0 %v1028_v1 }
 0x1a2   :  { %880 = vmatpush3.msra.mxu0 %v70_v53 }
 0x1a3   :  { %881 = vmatprep.subr.mxu0 %v1028_v1 }
 0x1a4   :  { %882 = vmatpush3.msra.mxu0 %v69_v54 }
 0x1a5   :  { %883 = vmatprep.subr.mxu0 %v1028_v1 }
 0x1a6   :  { %884 = vmatpush3.msra.mxu0 %v68_v55 }
 0x1a7   :  { %885 = vmatprep.subr.mxu0 %v1028_v1 }
 0x1a8   :  { %886 = vmatpush3.msra.mxu0 %v67_v56 }
 0x1a9   :  { %887 = vmatprep.subr.mxu0 %v1028_v1 }
 0x1aa   :  { %888 = vmatpush3.msra.mxu0 %v66_v57 }
 0x1ab   :  { %890 = vmatmul.mubr.msk.f32.vlgmr.msra.gmra.mxu0 %vm120_vm1, %v269_v49  ;;  %916 = vmatprep.subr.mxu0 %v1028_v1 }
 0x1ac   :  { %948 = vmatprep.mubr.msk.f32.mxu0 %vm1029_vm0, %v1028_v1  ;;  %917 = vmatpush3.msra.mxu0 %v103_v18 }
 0x1ad   :  { %918 = vmatprep.subr.mxu0 %v1028_v1 }
 0x1ae   :  { %919 = vmatpush3.msra.mxu0 %v102_v19 }
 0x1af   :  { %920 = vmatprep.subr.mxu0 %v1028_v1 }
 0x1b0   :  { %921 = vmatpush3.msra.mxu0 %v101_v20 }
 0x1b1   :  { %922 = vmatprep.subr.mxu0 %v1028_v1 }
 0x1b2   :  { %923 = vmatpush3.msra.mxu0 %v100_v21 }
 0x1b3   :  { %924 = vmatprep.subr.mxu0 %v1028_v1 }
 0x1b4   :  { %925 = vmatpush3.msra.mxu0 %v99_v22 }
 0x1b5   :  { %926 = vmatprep.subr.mxu0 %v1028_v1 }
 0x1b6   :  { %927 = vmatpush3.msra.mxu0 %v98_v23 }
 0x1b7   :  { %928 = vmatprep.subr.mxu0 %v1028_v1 }
 0x1b8   :  { %929 = vmatpush3.msra.mxu0 %v97_v24 }
 0x1b9   :  { %930 = vmatprep.subr.mxu0 %v1028_v1 }
 0x1ba   :  { %931 = vmatpush3.msra.mxu0 %v96_v25 }
 0x1bb   :  { %932 = vmatprep.subr.mxu0 %v1028_v1 }
 0x1bc   :  { %933 = vmatpush3.msra.mxu0 %v95_v26 }
 0x1bd   :  { %934 = vmatprep.subr.mxu0 %v1028_v1 }
 0x1be   :  { %935 = vmatpush3.msra.mxu0 %v94_v27 }
 0x1bf   :  { %936 = vmatprep.subr.mxu0 %v1028_v1 }
 0x1c0   :  { %937 = vmatpush3.msra.mxu0 %v93_v28 }
 0x1c1   :  { %938 = vmatprep.subr.mxu0 %v1028_v1 }
 0x1c2   :  { %939 = vmatpush3.msra.mxu0 %v92_v29 }
 0x1c3   :  { %940 = vmatprep.subr.mxu0 %v1028_v1 }
 0x1c4   :  { %941 = vmatpush3.msra.mxu0 %v91_v30 }
 0x1c5   :  { %942 = vmatprep.subr.mxu0 %v1028_v1 }
 0x1c6   :  { %943 = vmatpush3.msra.mxu0 %v90_v40 }
 0x1c7   :  { %944 = vmatprep.subr.mxu0 %v1028_v1 }
 0x1c8   :  { %945 = vmatpush3.msra.mxu0 %v89_v35 }
 0x1c9   :  { %946 = vmatprep.subr.mxu0 %v1028_v1 }
 0x1ca   :  { %947 = vmatpush3.msra.mxu0 %v88_v41 }
 0x25b   :  { %v343_v60 = vpop.f32.mrf.mxu0 }
 0x25c   :  { %v344_v61 = vadd.f32 %v717_v59, %v343_v60 }
 0x25d   :  { %v872_v62 = vpop.f32.mrf.mxu0 }
 0x25e   :  { %670 = vst.msk [vmem:[#allocation4] sm:$0xff] %vm436_vm2, %v344_v61 }
 0x26b   :  { %v417_v0 = vpop.f32.mrf.mxu0 }
 0x26c   :  { %v418_v2 = vadd.f32 %v719_v63, %v417_v0 }
 0x26d   :  { %v891_v3 = vpop.f32.mrf.mxu0 }
 0x26e   :  { %v421_v4 = vmul.f32 0.5, %v418_v2  ;;  %671 = vst.msk [vmem:[#allocation6] sm:$0xff] %vm436_vm2, %v418_v2 }
 0x270   :  { %v422_v5 = vmul.f32 1.442695, %v421_v4 }
 0x272   :  { %958 = vpow2.f32 %v422_v5 }
 0x27f   :  { %v959_v7 = vpop.eup %958 }
 0x280   :  { %v424_v8 = vmul.f32 %v959_v7, %v30_v6 }
 0x282   :  { %v425_v9 = vadd.f32 %v424_v8, %v344_v61 }
 0x284   :  { %895 = vmatmul.mubr.msk.f32.vlgmr.msra.gmra.mxu1 %vm436_vm2, %v425_v9 }
 0x285   :  { %898 = vmatpush3.msra.mxu1 %v86_v10  ;;  %913 = vmatprep.mubr.msk.f32.mxu1 %vm1029_vm0, %v1028_v1 }
 0x286   :  { %899 = vmatprep.subr.mxu1 %v1028_v1 }
 0x287   :  { %900 = vmatpush3.msra.mxu1 %v85_v11 }
 0x288   :  { %901 = vmatprep.subr.mxu1 %v1028_v1 }
 0x289   :  { %902 = vmatpush3.msra.mxu1 %v84_v12 }
 0x28a   :  { %903 = vmatprep.subr.mxu1 %v1028_v1 }
 0x28b   :  { %904 = vmatpush3.msra.mxu1 %v83_v13 }
 0x28c   :  { %905 = vmatprep.subr.mxu1 %v1028_v1 }
 0x28d   :  { %906 = vmatpush3.msra.mxu1 %v82_v14 }
 0x28e   :  { %907 = vmatprep.subr.mxu1 %v1028_v1 }
 0x28f   :  { %908 = vmatpush3.msra.mxu1 %v81_v15 }
 0x290   :  { %909 = vmatprep.subr.mxu1 %v1028_v1 }
 0x291   :  { %910 = vmatpush3.msra.mxu1 %v80_v16 }
 0x292   :  { %911 = vmatprep.subr.mxu1 %v1028_v1 }
 0x293   :  { %912 = vmatpush3.msra.mxu1 %v79_v17 }
 0x344   :  { %v506_v36 = vpop.f32.mrf.mxu1 }
 0x345   :  { %v507_v37 = vadd.f32 %v506_v36, %v435_v34 }
 0x346   :  { %v896_v38 = vpop.f32.mrf.mxu1 }
 0x347   :  { %v510_v39 = vmax.f32 %v507_v37, 0.0 }
 0x349   :  { %914 = vmatmul.mubr.msk.f32.vlgmr.msra.gmra.mxu1 %vm120_vm1, %v510_v39 }
 0x409   :  { %v584_v43 = vpop.f32.mrf.mxu1 }
 0x40a   :  { %v585_v44 = vadd.f32 %v724_v42, %v584_v43 }
 0x40b   :  { %v915_v45 = vpop.f32.mrf.mxu1 }
 0x40c   :  { %v588_v46 = vmax.f32 %v585_v44, 0.0 }
 0x40e   :  { %949 = vmatmul.mubr.f32.vlgmr.msra.gmra.mxu0 %v588_v46 }
 0x40f   :  { %975 = shalt.err (!%p972_p4)
}
 0x410   :  { %691 = dma.vmem_to_hbm [thread:$0]  %s689_s9, 128, %s1417_s7, [#allocation5]  }
 0x411   :  { %s1032_s3 = smov [#allocation6]  }
 0x412   :  { %s698_s12 = sshll.u32 %s1032_s3, 4  ;;  %s699_s12 = int_to_ptr.vmem [resolvable:$true] %s698_s12 }
 0x413   :  { %s984_s13 = scalar_lea.vmem %s699_s12, 128  ;;  %p989_p6 = scmp.lt.s32.totalorder %s699_s12, %s699_s12 }
 0x414   :  { %p985_p5 = scmp.ne.s32.totalorder %s699_s12, %s984_s13  ;;  %p990_p7 = scmp.lt.s32.totalorder %s984_s13, %s984_s13 }
 0x416   :  { %p991_p8 = por %p990_p7, %p989_p6 }
 0x418   :  { %p992_p9 = pnand %p991_p8, %p985_p5 }
 0x41a   :  { %995 = shalt.err (!%p992_p9)
}
 0x41b   :  { %701 = dma.vmem_to_hbm [thread:$0]  %s699_s12, 128, %s1418_s8, [#allocation5]   ;;  %v726_v1 = vld [vmem:[%s1414_s4 + $0x120] ss:$0 sm:$0xff] }
 0x41c   :  { %s1033_s7 = smov [#allocation2]  }
 0x41d   :  { %s678_s17 = sshll.u32 %s1033_s7, 4  ;;  %s679_s17 = int_to_ptr.vmem [resolvable:$true] %s678_s17 }
 0x41e   :  { %s1004_s18 = scalar_lea.vmem %s679_s17, 128  ;;  %p1009_p11 = scmp.lt.s32.totalorder %s679_s17, %s679_s17 }
 0x41f   :  { %p1005_p10 = scmp.ne.s32.totalorder %s679_s17, %s1004_s18  ;;  %p1010_p12 = scmp.lt.s32.totalorder %s1004_s18, %s1004_s18 }
 0x421   :  { %p1011_p13 = por %p1010_p12, %p1009_p11 }
 0x423   :  { %p1012_p0 = pnand %p1011_p13, %p1005_p10 }
 0x4ce   :  { %v659_v47 = vpop.f32.mrf.mxu0 }
 0x4cf   :  { %v660_v48 = vadd.f32 %v726_v1, %v659_v47 }
 0x4d0   :  { %v950_v49 = vpop.f32.mrf.mxu0 }
 0x4d1   :  { %v727_v50 = vmul.f32 -1.442695, %v660_v48 }
 0x4d3   :  { %960 = vpow2.f32 %v727_v50 }
 0x4e0   :  { %v961_v51 = vpop.eup %960 }
 0x4e1   :  { %v666_v52 = vadd.f32 1.0, %v961_v51 }
 0x4e3   :  { %962 = vrcp.f32 %v666_v52 }
 0x4f0   :  { %v963_v53 = vpop.eup %962 }
 0x4f1   :  { %669 = vst.msk [vmem:[#allocation2] sm:$0xff] %vm120_vm1, %v963_v53 }
 0x4f2   :  { %1015 = shalt.err (!%p1012_p0)
}
 0x4f3   :  { %681 = dma.vmem_to_hbm [thread:$0]  %s679_s17, 128, %s1416_s6, [#allocation3]  }
 0x4f4   :  { %1024 = dma.done.wait [#allocation3], 128  }
 0x4f5   :  { %1025 = vsyncadd [#allocation3], 4294967168 }
 0x4f6   :  { %1026 = dma.done.wait [#allocation5], 256  }
 0x4f7   :  { %1027 = vsyncadd [#allocation5], 4294967040 }
 0x4f8   :  { %711 = vsyncpa [#allocation3], 1 }
 0x4f9   :  { %712 = vsyncpa [#allocation5], 1 }

</bundles_post_ra>
